<compile_context>
chip_gen: v7x
topology: tpu7x:2x2x1
jax: 0.10.0
libtpu: 0.0.40
codegen_flags: <defaults>
</compile_context>

<pallas_src>
from functools import partial

import jax
import jax.numpy as jnp
from jax import lax
from jax.experimental import pallas as pl
from jax.experimental.pallas import tpu as pltpu


def _round_up(x, m):
    return (x + m - 1) // m * m


def _vmem_budget_bytes():
    """Per-generation VMEM budget (bytes) to size tiles against."""
    try:
        info = pltpu.get_tpu_info()
        phys = int(getattr(info, "vmem_capacity_bytes", 64 * 2**20))
    except Exception:
        phys = 64 * 2**20  # v7x per-TensorCore size: safe lower bound everywhere
    return int(phys * 0.70)


def _fit_tiles(tm, tn, tk, in_bytes, budget):
    """Shrink (tm, tn, tk) until the double-buffered working set fits `budget`."""
    def need(a, b, c):
        # 2x double-buffered x- and w-tiles + 2x f32 out-tile + bias tile.
        return 2 * (a * c + c * b) * in_bytes + 2 * a * b * 4 + 2 * b * 4

    while tk > 128 and need(tm, tn, tk) > budget:
        tk //= 2
    while tn > 128 and need(tm, tn, tk) > budget:
        tn //= 2
    while tm > 8 and need(tm, tn, tk) > budget:
        tm //= 2
    return tm, tn, tk


def _classifier_kernel(x_ref, w_ref, b_ref, out_ref):
    # x_ref: (tm, tk)  w_ref: (tk, tn)  b_ref: (1, tn) f32  out_ref: (tm, tn) f32
    # out_ref's block index (i, j) is constant across the reduction axis k, so
    # the block stays VMEM-resident and doubles as the f32 accumulator.
    @pl.when(pl.program_id(2) == 0)
    def _():
        out_ref[...] = jnp.broadcast_to(b_ref[...], out_ref.shape)

    out_ref[...] += jnp.dot(x_ref[...], w_ref[...],
                            preferred_element_type=jnp.float32)


def prepare_params(weight, bias, *, tm=256, tn=512, tk=1024,
                   compute_dtype=jnp.float32):
    """One-time parameter preparation (hoisted out of the forward path).

    weight: (2C, F) in PyTorch layout; bias: (2C,).
    Returns a dict with the padded, pre-transposed half-weight / half-bias and
    the tile sizes to use at forward time.
    """
    two_c, F = weight.shape
    C = two_c // 2

    # logits.view(B, 2, C)[:, 1, :] == logits[:, C:2C]  ->  only the second
    # half of the classifier participates.
    w_half = weight[C:, :]                 # (C, F)
    w_t = jnp.transpose(w_half)            # (F, C): plain x @ w, no per-step
                                           # RHS transpose inside the kernel.
    b_half = bias[C:]                      # (C,)

    in_bytes = jnp.dtype(compute_dtype).itemsize
    # Clamp tiles to the (8,128)-aligned problem size, then fit the VMEM budget.
    tn_eff = min(tn, _round_up(C, 128))
    tk_eff = min(tk, _round_up(F, 128))
    tm_eff, tn_eff, tk_eff = _fit_tiles(tm, tn_eff, tk_eff, in_bytes,
                                        _vmem_budget_bytes())

    Cp = _round_up(C, tn_eff)
    Fp = _round_up(F, tk_eff)

    w_p = w_t
    if (Fp, Cp) != (F, C):
        w_p = jnp.pad(w_p, ((0, Fp - F), (0, Cp - C)))   # zero-pad K: exact
    w_p = w_p.astype(compute_dtype)

    b_p = b_half
    if Cp != C:
        b_p = jnp.pad(b_p, (0, Cp - C))
    b_p = b_p.reshape(1, Cp).astype(jnp.float32)

    return dict(w_p=w_p, b_p=b_p, C=C, F=F, tm=tm_eff, tn=tn_eff, tk=tk_eff)


@partial(jax.jit, static_argnames=("C", "tm", "tn", "tk"))
def _forward_padded(feats, w_p, b_p, *, C, tm, tn, tk):
    B, F = feats.shape
    Fp, Cp = w_p.shape
    compute_dtype = w_p.dtype

    tm_eff = min(tm, _round_up(B, 8))
    Bp = _round_up(B, tm_eff)

    x = feats.astype(compute_dtype)
    if (Bp, Fp) != (B, F):
        x = jnp.pad(x, ((0, Bp - B), (0, Fp - F)))   # zero-pad K: exact

    grid = (Bp // tm_eff, Cp // tn, Fp // tk)

    # Explicit scoped-VMEM limit: raises the 16 MiB v5e default when tiles are
    # large, stays well under the 64 MiB per-core physical budget on v7x.
    in_bytes = jnp.dtype(compute_dtype).itemsize
    needed = (2 * (tm_eff * tk + tk * tn) * in_bytes
              + 2 * tm_eff * tn * 4 + 2 * tn * 4)
    vmem_limit = int(min(_vmem_budget_bytes(), max(2 * needed, 32 * 2**20)))

    out_p = pl.pallas_call(
        _classifier_kernel,
        out_shape=jax.ShapeDtypeStruct((Bp, Cp), jnp.float32),
        grid_spec=pltpu.PrefetchScalarGridSpec(
            num_scalar_prefetch=0,
            grid=grid,
            in_specs=[
                pl.BlockSpec((tm_eff, tk), lambda i, j, k: (i, k)),
                # NOTE: if profiling shows exposed weight-DMA time, try
                # pipeline_mode=pl.Buffered(3) on this spec.
                pl.BlockSpec((tk, tn), lambda i, j, k: (k, j)),
                pl.BlockSpec((1, tn), lambda i, j, k: (0, j)),
            ],
            out_specs=pl.BlockSpec((tm_eff, tn), lambda i, j, k: (i, j)),
        ),
        compiler_params=pltpu.CompilerParams(
            dimension_semantics=("parallel", "parallel", "arbitrary"),
            vmem_limit_bytes=vmem_limit),
    )(x, w_p, b_p)

    return out_p[:B, :C]


def muticlassifier_forward(feats, params):
    """feats: (B, F). Returns (B, C) == logits.view(B, 2, C)[:, 1, :]."""
    return _forward_padded(feats, params["w_p"], params["b_p"],
                           C=params["C"], tm=params["tm"],
                           tn=params["tn"], tk=params["tk"])


def init_params(key, feature_dim, num_classes):
    """Deterministic init matching the PyTorch module:
       xavier_uniform_(weight, gain=0.1), constant_(bias, 0.0)."""
    two_c = num_classes * 2
    gain = 0.1
    bound = gain * (6.0 / (feature_dim + two_c)) ** 0.5
    weight = jax.random.uniform(
        key, (two_c, feature_dim), jnp.float32, minval=-bound, maxval=bound)
    bias = jnp.zeros((two_c,), jnp.float32)
    return weight, bias


def reference_forward(feats, weight, bias):
    logits = jnp.dot(feats, weight.T, precision=lax.Precision.HIGHEST) + bias
    B = feats.shape[0]
    return logits.reshape(B, 2, -1)[:, 1, :]


if __name__ == "__main__":
    # Small shapes consistent with the module: B=2, feature_dim=32, num_classes=8.
    B, FEATURE_DIM, NUM_CLASSES = 2, 32, 8

    key = jax.random.PRNGKey(0)
    k_feat, k_w = jax.random.split(key)

    # Backbone output (net treated as identity -> features fed directly).
    feats = jax.random.normal(k_feat, (B, FEATURE_DIM), jnp.float32)
    weight, bias = init_params(k_w, FEATURE_DIM, NUM_CLASSES)
    ref = reference_forward(feats, weight, bias)

    # Default f32-operand path (tight match to the reference).
    params_f32 = prepare_params(weight, bias, compute_dtype=jnp.float32)
    out = jax.block_until_ready(muticlassifier_forward(feats, params_f32))
    assert out.shape == (B, NUM_CLASSES), out.shape
    assert jnp.allclose(out, ref, atol=1e-5, rtol=1e-5), \
        f"max err {jnp.max(jnp.abs(out - ref))}"

    # Accuracy-gated bf16-operand fast path (f32 accumulate in-kernel).
    params_bf16 = prepare_params(weight, bias, compute_dtype=jnp.bfloat16)
    out_bf16 = jax.block_until_ready(muticlassifier_forward(feats, params_bf16))
    assert out_bf16.shape == (B, NUM_CLASSES), out_bf16.shape
    assert jnp.allclose(out_bf16, ref, atol=2e-2, rtol=2e-2), \
        f"max err {jnp.max(jnp.abs(out_bf16 - ref))}"

    print("KERNEL_OK")
</pallas_src>

<mosaic_0001>
module attributes {stable_mosaic.version = 11 : i64} {
  func.func @_classifier_kernel(%arg0: i32, %arg1: i32, %arg2: i32, %arg3: memref<8x128xf32, #tpu.memory_space<vmem>>, %arg4: memref<128x128xf32, #tpu.memory_space<vmem>>, %arg5: memref<1x128xf32, #tpu.memory_space<vmem>>, %arg6: memref<8x128xf32, #tpu.memory_space<vmem>>) attributes {dimension_semantics = [#tpu.dimension_semantics<parallel>, #tpu.dimension_semantics<parallel>, #tpu.dimension_semantics<arbitrary>], iteration_bounds = array<i64: 1, 1, 1>, scalar_prefetch = 0 : i64, scratch_operands = 0 : i64, tpu.core_type = #tpu.core_type<tc>, window_params = [{transform_indices = @transform_0, window_bounds = array<i64: 8, 128>}, {transform_indices = @transform_1, window_bounds = array<i64: 128, 128>}, {transform_indices = @transform_2, window_bounds = array<i64: 1, 128>}, {transform_indices = @transform_3, window_bounds = array<i64: 8, 128>}]} {
    %c0_i32 = arith.constant 0 : i32
    %0 = arith.cmpi eq, %arg2, %c0_i32 : i32
    %1 = arith.extui %0 : i1 to i32
    %c0_i32_0 = arith.constant 0 : i32
    %2 = arith.cmpi ne, %1, %c0_i32_0 : i32
    scf.if %2 {
      %c0_8 = arith.constant 0 : index
      %c0_9 = arith.constant 0 : index
      %9 = vector.load %arg5[%c0_8, %c0_9] : memref<1x128xf32, #tpu.memory_space<vmem>>, vector<1x128xf32>
      %10 = vector.shape_cast %9 : vector<1x128xf32> to vector<1x128xf32>
      %11 = vector.broadcast %10 : vector<1x128xf32> to vector<8x128xf32>
      %c0_10 = arith.constant 0 : index
      %c0_11 = arith.constant 0 : index
      %12 = vector.load %arg6[%c0_10, %c0_11] : memref<8x128xf32, #tpu.memory_space<vmem>>, vector<8x128xf32>
      tpu.vector_store %arg6[%c0_10, %c0_11], %11 {strides = array<i32>} : memref<8x128xf32, #tpu.memory_space<vmem>>, vector<8x128xf32>,
    } else {
    }
    %c0 = arith.constant 0 : index
    %c0_1 = arith.constant 0 : index
    %3 = vector.load %arg6[%c0, %c0_1] : memref<8x128xf32, #tpu.memory_space<vmem>>, vector<8x128xf32>
    %c0_2 = arith.constant 0 : index
    %c0_3 = arith.constant 0 : index
    %4 = vector.load %arg3[%c0_2, %c0_3] : memref<8x128xf32, #tpu.memory_space<vmem>>, vector<8x128xf32>
    %c0_4 = arith.constant 0 : index
    %c0_5 = arith.constant 0 : index
    %5 = vector.load %arg4[%c0_4, %c0_5] : memref<128x128xf32, #tpu.memory_space<vmem>>, vector<128x128xf32>
    %cst = arith.constant dense<0.000000e+00> : vector<8x128xf32>
    %6 = tpu.matmul %4, %5, %cst {dimension_numbers = #tpu.dot_dimension_numbers<[1], [0], [0], [1], [0, 0, 1, 1], [], []>} : vector<8x128xf32>, vector<128x128xf32>, vector<8x128xf32> -> vector<8x128xf32>
    %7 = arith.addf %3, %6 : vector<8x128xf32>
    %c0_6 = arith.constant 0 : index
    %c0_7 = arith.constant 0 : index
    %8 = vector.load %arg6[%c0_6, %c0_7] : memref<8x128xf32, #tpu.memory_space<vmem>>, vector<8x128xf32>
    tpu.vector_store %arg6[%c0_6, %c0_7], %7 {strides = array<i32>} : memref<8x128xf32, #tpu.memory_space<vmem>>, vector<8x128xf32>,
    return
  }
  func.func @transform_0(%arg0: i32, %arg1: i32, %arg2: i32) -> (i32, i32) {
    %c0_i32 = arith.constant 0 : i32
    return %arg0, %arg2 : i32, i32
  }
  func.func @transform_1(%arg0: i32, %arg1: i32, %arg2: i32) -> (i32, i32) {
    %c0_i32 = arith.constant 0 : i32
    return %arg2, %arg1 : i32, i32
  }
  func.func @transform_2(%arg0: i32, %arg1: i32, %arg2: i32) -> (i32, i32) {
    %c0_i32 = arith.constant 0 : i32
    %c0_i32_0 = arith.constant 0 : i32
    return %c0_i32, %arg1 : i32, i32
  }
  func.func @transform_3(%arg0: i32, %arg1: i32, %arg2: i32) -> (i32, i32) {
    %c0_i32 = arith.constant 0 : i32
    return %arg0, %arg1 : i32, i32
  }
}

</mosaic_0001>

<bundles_post_ra>
// kernel: _forward_padded.1
= control target key start
LH: loop header
LB: loop body
LE: loop exit
PB: predicated region body
PF: predicated region fallthrough
CT: control target
= control target key end

     0   :  { %8 = vsyncpa [#allocation3], 0  ;;  %s242_s12 = smov [#allocation2]   ;;  %s289_s0 = inlined_call_operand.vmem [shape: f32[8,128], index: 0, kind: input, shape index: {}]   ;;  %s290_s1 = inlined_call_operand.hbm [shape: f32[128,128], index: 1, kind: input, shape index: {}]   ;;  %s291_s2 = inlined_call_operand.vmem [shape: f32[1,128], index: 2, kind: input, shape index: {}]   ;;  %s292_s3 = inlined_call_operand.vmem [shape: f32[8,128], index: 3, kind: output, shape index: {}]  }
   0x1   :  { %s16_s13 = sshll.u32 %s242_s12, 4  ;;  %s218_s16 = scalar_lea.hbm %s290_s1, 2048  ;;  %s17_s13 = int_to_ptr.vmem [resolvable:$true] %s16_s13 }
   0x2   :  { %p219_p0 = scmp.ne.s32.totalorder %s290_s1, %s218_s16  ;;  %p222_p1 = scmp.lt.u32.totalorder %s218_s16, %s290_s1 }
   0x4   :  { %p224_p2 = pnand %p222_p1, %p219_p0 }
   0x6   :  { %227 = shalt.err (!%p224_p2)
}
   0x7   :  { %s228_s21 = scalar_lea.vmem %s17_s13, 2048  ;;  %p233_p4 = scmp.lt.s32.totalorder %s17_s13, %s17_s13 }
   0x8   :  { %p229_p3 = scmp.ne.s32.totalorder %s17_s13, %s228_s21  ;;  %p234_p5 = scmp.lt.s32.totalorder %s228_s21, %s228_s21 }
   0xa   :  { %p235_p6 = por %p234_p5, %p233_p4 }
   0xc   :  { %p236_p7 = pnand %p235_p6, %p229_p3 }
   0xe   :  { %239 = shalt.err (!%p236_p7)
}
   0xf   :  { %s243_s22 = smov 128   ;;  %s244_s23 = smov 8  }
  0x10   :  { %22 = dma.hbm_to_vmem [thread:$0]  %s290_s1, 2048, %s17_s13, [#allocation3], %s243_s22, %s243_s22, %s244_s23  }
  0x11   :  { %240 = dma.done.wait [#allocation3], 2048  }
  0x12   :  { %241 = vsyncadd [#allocation3], 4294965248  ;;  %v245_v0 = vmov 0.0|0.0   ;;  %vm246_vm0 = vmmov 0   ;;  %v247_v1 = vmov 0.0   ;;  %v42_v2 = vld [vmem:[#allocation2] sm:$0xff] }
  0x13   :  { %188 = vmatprep.subr.bf16.mxu0 %v245_v0  ;;  %185 = vmatprep.mubr.msk.f32.mxu0 %vm246_vm0, %v247_v1  ;;  %v43_v3 = vld [vmem:[#allocation2 + $0x8] sm:$0xff]  ;;  %v44_v4 = vld [vmem:[#allocation2 + $0x10] sm:$0xff]  ;;  %v45_v6 = vld [vmem:[#allocation2 + $0x18] sm:$0xff] }
  0x14   :  { %v189_v5 = vpack.c.bf16 %v43_v3, %v42_v2  ;;  %v192_v7 = vpack.c.bf16 %v45_v6, %v44_v4  ;;  %v46_v8 = vld [vmem:[#allocation2 + $0x20] sm:$0xff]  ;;  %v47_v9 = vld [vmem:[#allocation2 + $0x28] sm:$0xff]  ;;  %v48_v11 = vld [vmem:[#allocation2 + $0x30] sm:$0xff] }
  0x15   :  { %v195_v10 = vpack.c.bf16 %v47_v9, %v46_v8  ;;  %v49_v12 = vld [vmem:[#allocation2 + $0x38] sm:$0xff]  ;;  %v50_v14 = vld [vmem:[#allocation2 + $0x40] sm:$0xff]  ;;  %v51_v15 = vld [vmem:[#allocation2 + $0x48] sm:$0xff] }
  0x16   :  { %190 = vmatpush3.bf16.msra.mxu0 %v189_v5  ;;  %v198_v13 = vpack.c.bf16 %v49_v12, %v48_v11  ;;  %v201_v16 = vpack.c.bf16 %v51_v15, %v50_v14  ;;  %v52_v17 = vld [vmem:[#allocation2 + $0x50] sm:$0xff]  ;;  %v53_v18 = vld [vmem:[#allocation2 + $0x58] sm:$0xff]  ;;  %v54_v20 = vld [vmem:[#allocation2 + $0x60] sm:$0xff] }
  0x17   :  { %191 = vmatprep.subr.bf16.mxu0 %v245_v0  ;;  %v204_v19 = vpack.c.bf16 %v53_v18, %v52_v17  ;;  %v55_v21 = vld [vmem:[#allocation2 + $0x68] sm:$0xff]  ;;  %v56_v23 = vld [vmem:[#allocation2 + $0x70] sm:$0xff]  ;;  %v57_v24 = vld [vmem:[#allocation2 + $0x78] sm:$0xff] }
  0x18   :  { %v207_v22 = vpack.c.bf16 %v55_v21, %v54_v20  ;;  %v210_v25 = vpack.c.bf16 %v57_v24, %v56_v23  ;;  %v41_v26 = vld [vmem:[%s289_s0] sm:$0xff] }
  0x19   :  { %v135_v27 = vld [vmem:[%s291_s2] ss:$0 sm:$0xff] }
  0x1a   :  { %193 = vmatpush3.bf16.msra.mxu0 %v192_v7 }
  0x1b   :  { %194 = vmatprep.subr.bf16.mxu0 %v245_v0 }
  0x1e   :  { %196 = vmatpush3.bf16.msra.mxu0 %v195_v10 }
  0x1f   :  { %197 = vmatprep.subr.bf16.mxu0 %v245_v0 }
  0x22   :  { %199 = vmatpush3.bf16.msra.mxu0 %v198_v13 }
  0x23   :  { %200 = vmatprep.subr.bf16.mxu0 %v245_v0 }
  0x26   :  { %202 = vmatpush3.bf16.msra.mxu0 %v201_v16 }
  0x27   :  { %203 = vmatprep.subr.bf16.mxu0 %v245_v0 }
  0x2a   :  { %205 = vmatpush3.bf16.msra.mxu0 %v204_v19 }
  0x2b   :  { %206 = vmatprep.subr.bf16.mxu0 %v245_v0 }
  0x2e   :  { %208 = vmatpush3.bf16.msra.mxu0 %v207_v22 }
  0x2f   :  { %209 = vmatprep.subr.bf16.mxu0 %v245_v0 }
  0x32   :  { %211 = vmatpush3.bf16.msra.mxu0 %v210_v25 }
  0x35   :  { %186 = vmatmul.mubr.f32.vlgmr.msra.gmra.mrb[0].mxu0 %v41_v26 }
 0x108   :  { %v124_v28 = vpop.f32.mrb[0].mxu0 }
 0x109   :  { %v128_v29 = vadd.f32 %v135_v27, %v124_v28  ;;  %v187_v30 = vpop.f32.mrb[1].mxu0 }
 0x10b   :  { %129 = vst [vmem:[%s292_s3] sm:$0xff] %v128_v29 }
 0x10c   :  { %134 = vsyncpa [#allocation3], 1 }

</bundles_post_ra>
